<compile_context>
chip_gen: v5e
topology: v5e:2x2
jax: 0.10.0
libtpu: 0.0.40
codegen_flags: <defaults>
</compile_context>

<pallas_src>
import functools

import jax
import jax.numpy as jnp
from jax.experimental import pallas as pl
from jax.experimental.pallas import tpu as pltpu


_EPS_SQ = 1e-24          # (1e-12)^2 clamp from F.normalize
_NEG_BIG = -1e30         # finite "-inf": avoids inf-inf -> NaN on masked entries


def _round_up(x, m):
    return ((x + m - 1) // m) * m


# ---------------------------------------------------------------------------
# Kernel 1: normalize f2 column-wise in its (Dp, B) transposed layout and emit
# the bf16 MXU-ready rhs cache.  (The one-time HBM transpose of raw f2 is done
# in the wrapper: pure layout plumbing.)
# ---------------------------------------------------------------------------
def _normalize_t_kernel(f2t_ref, f2nt_ref):
    x = f2t_ref[...].astype(jnp.float32)                              # (Dp, TN)
    inv = jax.lax.rsqrt(
        jnp.maximum(jnp.sum(x * x, axis=0, keepdims=True), jnp.float32(_EPS_SQ)))
    f2nt_ref[...] = (x * inv).astype(f2nt_ref.dtype)                  # bf16 (Dp, TN)


# ---------------------------------------------------------------------------
# Kernel 2: one independent row tile of the contrastive loss.
#   outputs per tile:  sum(lse_row - diag), sum(diag),
#                      per-column max and per-column sum-of-exp (own reference).
# ---------------------------------------------------------------------------
def _clip_tile_kernel(scale_ref, f1_ref, f2nt_ref,
                      rowpart_ref, diagpart_ref, colmax_ref, colsum_ref,
                      *, tq, b, b_pad, need_mask):
    i = pl.program_id(0)
    scale = scale_ref[0]
    neg = jnp.float32(_NEG_BIG)

    # ---- normalize f1 row tile; fold logit_scale into the inverse norm ----
    f1 = f1_ref[...].astype(jnp.float32)                              # (TQ, Dp)
    inv1 = jax.lax.rsqrt(
        jnp.maximum(jnp.sum(f1 * f1, axis=-1, keepdims=True), jnp.float32(_EPS_SQ)))
    lhs = (f1 * (inv1 * scale)).astype(jnp.bfloat16)                  # (TQ, Dp) bf16

    # ---- canonical (TQ,Dp) @ (Dp,B) matmul on the MXU, f32 accumulation ----
    logits = jax.lax.dot_general(
        lhs, f2nt_ref[...], (((1,), (0,)), ((), ())),
        preferred_element_type=jnp.float32)                           # (TQ, B_pad)

    row0 = i * tq
    row_ids = row0 + jax.lax.broadcasted_iota(jnp.int32, (tq, b_pad), 0)
    col_ids = jax.lax.broadcasted_iota(jnp.int32, (tq, b_pad), 1)

    if need_mask:
        valid = (row_ids < b) & (col_ids < b)
        logits = jnp.where(valid, logits, neg)

    # ---- diagonal from the same bf16 logits (consistent with both lse's) ----
    diag = jnp.sum(jnp.where(col_ids == row_ids, logits, 0.0),
                   axis=1, keepdims=True)                             # (TQ, 1)

    # ---- row-direction logsumexp (image loss) ----
    m_row = jnp.max(logits, axis=1, keepdims=True)
    p_row = jnp.exp(logits - m_row)
    lse_row = jnp.log(jnp.sum(p_row, axis=1, keepdims=True)) + m_row

    per_row = lse_row - diag
    if need_mask:
        rvec = row0 + jax.lax.broadcasted_iota(jnp.int32, (tq, 1), 0)
        row_valid = rvec < b
        per_row = jnp.where(row_valid, per_row, 0.0)
        diag = jnp.where(row_valid, diag, 0.0)

    rowpart_ref[...] = jnp.broadcast_to(jnp.sum(per_row), (1, 1, 1))
    diagpart_ref[...] = jnp.broadcast_to(jnp.sum(diag), (1, 1, 1))

    # ---- column-direction partial stats, referenced to THIS tile's own max ----
    # (numerically safe for any logit range; merged across tiles in the wrapper)
    m_col = jnp.max(logits, axis=0, keepdims=True)                    # (1, B_pad)
    p_col = jnp.exp(logits - m_col)
    s_col = jnp.sum(p_col, axis=0, keepdims=True)                     # (1, B_pad)
    colmax_ref[...] = m_col.reshape(1, 1, b_pad)
    colsum_ref[...] = s_col.reshape(1, 1, b_pad)


def clip_loss(image_features_1, image_features_2, logit_scale, *, tq=None):
    """image_features_*: [B, D]; logit_scale: scalar or (1,) f32 -> scalar f32 loss."""
    f1 = jnp.asarray(image_features_1)
    f2 = jnp.asarray(image_features_2)
    b, d = f1.shape
    assert f2.shape == (b, d)

    d_pad = _round_up(max(d, 128), 128)
    b_pad = _round_up(max(b, 128), 128)

    f1p = jnp.pad(f1.astype(jnp.float32), ((0, b_pad - b), (0, d_pad - d)))
    # One-time XLA transpose (layout plumbing) so the normalized cache is written
    # directly in the MXU-native (Dp, B) rhs orientation.
    f2tp = jnp.pad(f2.astype(jnp.float32).T, ((0, d_pad - d), (0, b_pad - b)))

    # ---- VMEM budget (feedback: cap TQ by VMEM, set vmem_limit_bytes) ----
    try:
        vmem_cap = int(getattr(pltpu.get_tpu_info(), "vmem_capacity_bytes",
                               64 * 1024 * 1024))
    except Exception:  # pragma: no cover - defensive fallback
        vmem_cap = 64 * 1024 * 1024
    budget = int(0.65 * vmem_cap)

    def main_vmem_est(t):
        rhs = 2 * d_pad * b_pad * 2       # resident bf16 f2nT (assume 2 buffers)
        lhs = 2 * t * d_pad * 4           # double-buffered f1 row tiles (f32)
        tmp = 4 * t * b_pad * 4           # logits / p_row / p_col / mask transients
        outs = 4 * 2 * (b_pad + 8) * 4
        return rhs + lhs + tmp + outs

    if tq is None:
        tq = 8
        for cand in (1024, 512, 256, 128, 64, 32, 16, 8):
            if cand <= b_pad and b_pad % cand == 0 and main_vmem_est(cand) <= budget:
                tq = cand
                break
    assert b_pad % tq == 0
    n_tiles = b_pad // tq
    need_mask = (b_pad != b)

    main_limit = int(1.25 * main_vmem_est(tq)) + (2 << 20)
    main_limit = min(max(main_limit, 32 << 20), int(0.95 * vmem_cap), 128 << 20)

    # ---- kernel 1: bf16 transposed normalized-f2 cache ----
    tn = 128
    for cand in (1024, 512, 256, 128):
        if cand <= b_pad and b_pad % cand == 0 and 24 * d_pad * cand <= budget:
            tn = cand
            break
    norm_limit = min(max(int(1.5 * 24 * d_pad * tn), 32 << 20),
                     int(0.95 * vmem_cap), 128 << 20)

    f2nt = pl.pallas_call(
        _normalize_t_kernel,
        out_shape=jax.ShapeDtypeStruct((d_pad, b_pad), jnp.bfloat16),
        grid_spec=pltpu.PrefetchScalarGridSpec(
            num_scalar_prefetch=0,
            grid=(b_pad // tn,),
            in_specs=[pl.BlockSpec((d_pad, tn), lambda i: (0, i))],
            out_specs=pl.BlockSpec((d_pad, tn), lambda i: (0, i)),
        ),
        compiler_params=pltpu.CompilerParams(
            dimension_semantics=("parallel",),
            vmem_limit_bytes=norm_limit),
    )(f2tp)

    # ---- kernel 2: row-tiled, fully parallel main loop ----
    scale = jnp.asarray(logit_scale, dtype=jnp.float32).reshape((1,))
    kernel = functools.partial(_clip_tile_kernel, tq=tq, b=b, b_pad=b_pad,
                               need_mask=need_mask)

    out_shapes = (
        jax.ShapeDtypeStruct((n_tiles, 1, 1), jnp.float32),      # sum(lse_row - diag)
        jax.ShapeDtypeStruct((n_tiles, 1, 1), jnp.float32),      # sum(diag)
        jax.ShapeDtypeStruct((n_tiles, 1, b_pad), jnp.float32),  # per-tile col max
        jax.ShapeDtypeStruct((n_tiles, 1, b_pad), jnp.float32),  # per-tile col sumexp
    )

    rowpart, diagpart, colmax, colsum = pl.pallas_call(
        kernel,
        out_shape=out_shapes,
        grid_spec=pltpu.PrefetchScalarGridSpec(
            num_scalar_prefetch=0,
            grid=(n_tiles,),
            in_specs=[
                pl.BlockSpec(memory_space=pltpu.MemorySpace.SMEM),   # logit_scale
                pl.BlockSpec((tq, d_pad), lambda i: (i, 0)),         # f1 row tiles
                pl.BlockSpec((d_pad, b_pad), lambda i: (0, 0)),      # f2nT resident
            ],
            out_specs=(
                pl.BlockSpec((1, 1, 1), lambda i: (i, 0, 0)),
                pl.BlockSpec((1, 1, 1), lambda i: (i, 0, 0)),
                pl.BlockSpec((1, 1, b_pad), lambda i: (i, 0, 0)),
                pl.BlockSpec((1, 1, b_pad), lambda i: (i, 0, 0)),
            ),
        ),
        compiler_params=pltpu.CompilerParams(
            # No cross-iteration state -> independent row tiles; on v7x this lets
            # the two TensorCores split the grid.
            dimension_semantics=("parallel",),
            vmem_limit_bytes=main_limit),
    )(scale, f1p, f2nt)

    # ---- tiny O(n_tiles * B) logsumexp-combine in plain XLA ----
    rowpart = rowpart.reshape(n_tiles)
    diagpart = diagpart.reshape(n_tiles)
    colmax = colmax.reshape(n_tiles, b_pad)
    colsum = colsum.reshape(n_tiles, b_pad)

    m = jnp.max(colmax, axis=0)                                       # (b_pad,)
    s = jnp.sum(colsum * jnp.exp(colmax - m[None, :]), axis=0)
    lse_col = jnp.log(s) + m
    if need_mask:
        lse_col = jnp.where(jnp.arange(b_pad) < b, lse_col, 0.0)

    loss_img = jnp.sum(rowpart)
    loss_txt = jnp.sum(lse_col) - jnp.sum(diagpart)
    return (loss_img + loss_txt) / jnp.float32(2 * b)


def clip_loss_ref(f1, f2, scale):
    """Pure-JAX f32 reference matching the PyTorch module exactly."""
    f1 = f1.astype(jnp.float32)
    f2 = f2.astype(jnp.float32)
    f1 = f1 / jnp.linalg.norm(f1, axis=-1, keepdims=True)
    f2 = f2 / jnp.linalg.norm(f2, axis=-1, keepdims=True)
    f1 = f1 / jnp.maximum(jnp.linalg.norm(f1, axis=-1, keepdims=True), 1e-12)
    f2 = f2 / jnp.maximum(jnp.linalg.norm(f2, axis=-1, keepdims=True), 1e-12)
    logits = scale * (f1 @ f2.T)
    bsz = logits.shape[0]
    labels = jnp.arange(bsz)

    def ce(lg):
        lse = jax.scipy.special.logsumexp(lg, axis=1)
        return jnp.mean(lse - lg[jnp.arange(bsz), labels])

    return (ce(logits) + ce(logits.T)) / 2.0


if __name__ == "__main__":
    B, D = 8, 32  # small shapes consistent with the module's [batch, feature] inputs
    key = jax.random.PRNGKey(0)
    k1, k2 = jax.random.split(key)
    image_features_1 = jax.random.normal(k1, (B, D), dtype=jnp.float32)
    image_features_2 = jax.random.normal(k2, (B, D), dtype=jnp.float32)
    # Deterministic "parameter": CLIP-style logit scale = exp(ln(1/0.07))
    logit_scale = jnp.array([1.0 / 0.07], dtype=jnp.float32)

    loss = clip_loss(image_features_1, image_features_2, logit_scale)
    jax.block_until_ready(loss)

    ref = clip_loss_ref(image_features_1, image_features_2, logit_scale[0])
    # bf16 MXU operands (per perf guidance) give ~1e-3..1e-2 deviation from the
    # strict f32 PyTorch semantics at logit_scale ~ 14; tolerance sized for that.
    assert jnp.isfinite(loss), loss
    assert jnp.allclose(loss, ref, atol=2e-2, rtol=2e-2), (loss, ref)

    print("KERNEL_OK")
</pallas_src>

<mosaic_0001>
module attributes {stable_mosaic.version = 11 : i64} {
  func.func @_normalize_t_kernel(%arg0: i32, %arg1: memref<128x128xf32, #tpu.memory_space<vmem>>, %arg2: memref<128x128xbf16, #tpu.memory_space<vmem>>) attributes {dimension_semantics = [#tpu.dimension_semantics<parallel>], iteration_bounds = array<i64: 1>, scalar_prefetch = 0 : i64, scratch_operands = 0 : i64, tpu.core_type = #tpu.core_type<tc>, window_params = [{transform_indices = @transform_0, window_bounds = array<i64: 128, 128>}, {transform_indices = @transform_1, window_bounds = array<i64: 128, 128>}]} {
    %c0 = arith.constant 0 : index
    %c0_0 = arith.constant 0 : index
    %0 = vector.load %arg1[%c0, %c0_0] : memref<128x128xf32, #tpu.memory_space<vmem>>, vector<128x128xf32>
    %1 = arith.mulf %0, %0 : vector<128x128xf32>
    %cst = arith.constant dense<0.000000e+00> : vector<128xf32>
    %2 = vector.multi_reduction <add>, %1, %cst [0] : vector<128x128xf32> to vector<128xf32>
    %3 = vector.shape_cast %2 : vector<128xf32> to vector<1x128xf32>
    %cst_1 = arith.constant 1.000000e-24 : f32
    %4 = vector.broadcast %cst_1 : f32 to vector<1x128xf32>
    %5 = arith.maximumf %3, %4 : vector<1x128xf32>
    %6 = math.rsqrt %5 : vector<1x128xf32>
    %7 = vector.broadcast %6 : vector<1x128xf32> to vector<128x128xf32>
    %8 = arith.mulf %0, %7 : vector<128x128xf32>
    %9 = arith.truncf %8 : vector<128x128xf32> to vector<128x128xbf16>
    %c0_2 = arith.constant 0 : index
    %c0_3 = arith.constant 0 : index
    %10 = vector.load %arg2[%c0_2, %c0_3] : memref<128x128xbf16, #tpu.memory_space<vmem>>, vector<128x128xbf16>
    tpu.vector_store %arg2[%c0_2, %c0_3], %9 {strides = array<i32>} : memref<128x128xbf16, #tpu.memory_space<vmem>>, vector<128x128xbf16>,
    return
  }
  func.func @transform_0(%arg0: i32) -> (i32, i32) {
    %c0_i32 = arith.constant 0 : i32
    %c0_i32_0 = arith.constant 0 : i32
    return %c0_i32, %arg0 : i32, i32
  }
  func.func @transform_1(%arg0: i32) -> (i32, i32) {
    %c0_i32 = arith.constant 0 : i32
    %c0_i32_0 = arith.constant 0 : i32
    return %c0_i32, %arg0 : i32, i32
  }
}

</mosaic_0001>

<bundles_post_ra>
// kernel: tpu_custom_call.1
= control target key start
LH: loop header
LB: loop body
LE: loop exit
PB: predicated region body
PF: predicated region fallthrough
CT: control target
= control target key end

     0   :  { %6 = vsyncpa [#allocation3], 0  ;;  %s305_s0 = inlined_call_operand.hbm [shape: f32[128,128], index: 0, kind: input, shape index: {}]   ;;  %s306_s1 = inlined_call_operand.hbm [shape: bf16[128,128], index: 1, kind: output, shape index: {}]  }
   0x1   :  { %7 = vsyncpa [#allocation4], 0  ;;  %s12_s8 = sshll.u32 %s305_s0, 4  ;;  %s263_s9 = smov [#allocation2]   ;;  %s13_s8 = int_to_ptr.hbm [resolvable:$true] %s12_s8 }
   0x2   :  { %s14_s10 = sshll.u32 %s263_s9, 4  ;;  %s264_s11 = smov 128   ;;  %s15_s10 = int_to_ptr.vmem [resolvable:$true] %s14_s10 }
   0x3   :  { %s265_s12 = smov 8  }
   0x4   :  { %20 = dma.hbm_to_vmem [thread:$0]  %s13_s8, 2048, %s15_s10, [#allocation3], %s264_s11, %s264_s11, %s265_s12  }
   0x5   :  { %259 = dma.done.wait [#allocation3], 2048  }
   0x6   :  { %260 = vsyncadd [#allocation3], 4294965248  ;;  %v282_v0 = vld [vmem:[#allocation2] sm:$0xff]  ;;  %v284_v1 = vld [vmem:[#allocation2 + $0x8] sm:$0xff]  ;;  %s266_s0 = smov [#allocation5]   ;;  %s143_s16 = sshll.u32 %s306_s1, 4  ;;  %s144_s16 = int_to_ptr.hbm [resolvable:$true] %s143_s16 }
   0x7   :  { %v286_v2 = vld [vmem:[#allocation2 + $0x10] sm:$0xff]  ;;  %v288_v3 = vld [vmem:[#allocation2 + $0x18] sm:$0xff]  ;;  %v41_v4 = vmul.f32 %v282_v0, %v282_v0  ;;  %v42_v5 = vmul.f32 %v284_v1, %v284_v1  ;;  %v29_v7 = vld [vmem:[#allocation2 + $0x20] sm:$0xff]  ;;  %s141_s13 = sshll.u32 %s266_s0, 4  ;;  %s267_s17 = smov 64   ;;  %s142_s13 = int_to_ptr.vmem [resolvable:$true] %s141_s13 }
   0x8   :  { %v43_v6 = vmul.f32 %v286_v2, %v286_v2  ;;  %v44_v8 = vmul.f32 %v288_v3, %v288_v3  ;;  %v30_v10 = vld [vmem:[#allocation2 + $0x28] sm:$0xff]  ;;  %v45_v11 = vmul.f32 %v29_v7, %v29_v7  ;;  %v31_v13 = vld [vmem:[#allocation2 + $0x30] sm:$0xff]  ;;  %v32_v16 = vld [vmem:[#allocation2 + $0x38] sm:$0xff]  ;;  %s268_s18 = smov 4  }
   0x9   :  { %v57_v9 = vadd.f32 %v42_v5, %v41_v4  ;;  %v46_v14 = vmul.f32 %v30_v10, %v30_v10  ;;  %v47_v17 = vmul.f32 %v31_v13, %v31_v13  ;;  %v33_v19 = vld [vmem:[#allocation2 + $0x40] sm:$0xff]  ;;  %v48_v20 = vmul.f32 %v32_v16, %v32_v16  ;;  %v34_v22 = vld [vmem:[#allocation2 + $0x48] sm:$0xff]  ;;  %v35_v25 = vld [vmem:[#allocation2 + $0x50] sm:$0xff] }
   0xa   :  { %v49_v23 = vmul.f32 %v33_v19, %v33_v19  ;;  %v50_v26 = vmul.f32 %v34_v22, %v34_v22  ;;  %v36_v28 = vld [vmem:[#allocation2 + $0x58] sm:$0xff]  ;;  %v51_v29 = vmul.f32 %v35_v25, %v35_v25  ;;  %v37_v31 = vld [vmem:[#allocation2 + $0x60] sm:$0xff]  ;;  %v38_v34 = vld [vmem:[#allocation2 + $0x68] sm:$0xff] }
   0xb   :  { %v58_v12 = vadd.f32 %v57_v9, %v43_v6  ;;  %v52_v32 = vmul.f32 %v36_v28, %v36_v28  ;;  %v53_v35 = vmul.f32 %v37_v31, %v37_v31  ;;  %v39_v37 = vld [vmem:[#allocation2 + $0x70] sm:$0xff]  ;;  %v54_v38 = vmul.f32 %v38_v34, %v38_v34  ;;  %v40_v40 = vld [vmem:[#allocation2 + $0x78] sm:$0xff] }
   0xc   :  { %v55_v41 = vmul.f32 %v39_v37, %v39_v37  ;;  %v56_v43 = vmul.f32 %v40_v40, %v40_v40 }
   0xd   :  { %v59_v15 = vadd.f32 %v58_v12, %v44_v8 }
   0xf   :  { %v60_v18 = vadd.f32 %v59_v15, %v45_v11 }
  0x11   :  { %v61_v21 = vadd.f32 %v60_v18, %v46_v14 }
  0x13   :  { %v62_v24 = vadd.f32 %v61_v21, %v47_v17 }
  0x15   :  { %v63_v27 = vadd.f32 %v62_v24, %v48_v20 }
  0x17   :  { %v64_v30 = vadd.f32 %v63_v27, %v49_v23 }
  0x19   :  { %v65_v33 = vadd.f32 %v64_v30, %v50_v26 }
  0x1b   :  { %v66_v36 = vadd.f32 %v65_v33, %v51_v29 }
  0x1d   :  { %v67_v39 = vadd.f32 %v66_v36, %v52_v32 }
  0x1f   :  { %v68_v42 = vadd.f32 %v67_v39, %v53_v35 }
  0x21   :  { %v69_v44 = vadd.f32 %v68_v42, %v54_v38 }
  0x23   :  { %v70_v45 = vadd.f32 %v69_v44, %v55_v41 }
  0x25   :  { %v71_v46 = vadd.f32 %v70_v45, %v56_v43 }
  0x27   :  { %v72_v47 = vrot.slane %v71_v46, 4 }
  0x29   :  { %v73_v48 = vadd.f32 %v72_v47, %v71_v46 }
  0x2b   :  { %v74_v49 = vrot.slane %v73_v48, 2 }
  0x2d   :  { %v75_v50 = vadd.f32 %v74_v49, %v73_v48 }
  0x2f   :  { %v76_v51 = vrot.slane %v75_v50, 1 }
  0x31   :  { %v77_v52 = vadd.f32 %v76_v51, %v75_v50 }
  0x33   :  { %v78_v53 = vmax.f32 %v77_v52, 1e-24 }
  0x35   :  { %209 = vrsqrt.f32 %v78_v53  ;;  %vm85_vm0 = vweird.f32 %v78_v53 }
  0x3b   :  { %v210_v54 = vpop.eup %209 }
  0x3c   :  { %v80_v55 = vmul.f32 %v210_v54, %v78_v53  ;;  %vm86_vm1 = vweird.f32 %v210_v54 }
  0x3d   :  { %vm87_vm2 = vmor %vm85_vm0, %vm86_vm1 }
  0x3e   :  { %v81_v56 = vmul.f32 %v210_v54, %v80_v55 }
  0x40   :  { %v82_v57 = vmul.f32 0.5, %v81_v56 }
  0x42   :  { %v83_v58 = vsub.f32 1.5, %v82_v57 }
  0x44   :  { %v84_v59 = vmul.f32 %v210_v54, %v83_v58 }
  0x46   :  { %v88_v60 = vsel %vm87_vm2, %v210_v54, %v84_v59 }
  0x47   :  { %v89_v61 = vmul.f32 %v88_v60, %v282_v0  ;;  %v90_v62 = vmul.f32 %v88_v60, %v284_v1  ;;  %v91_v63 = vmul.f32 %v88_v60, %v286_v2  ;;  %v92_v4 = vmul.f32 %v88_v60, %v288_v3 }
  0x48   :  { %v93_v5 = vmul.f32 %v88_v60, %v29_v7  ;;  %v94_v6 = vmul.f32 %v88_v60, %v30_v10  ;;  %v95_v8 = vmul.f32 %v88_v60, %v31_v13  ;;  %v96_v9 = vmul.f32 %v88_v60, %v32_v16 }
  0x49   :  { %v159_v11 = vpack.c.bf16 %v90_v62, %v89_v61  ;;  %v164_v12 = vpack.c.bf16 %v92_v4, %v91_v63  ;;  %v97_v14 = vmul.f32 %v88_v60, %v33_v19  ;;  %v98_v15 = vmul.f32 %v88_v60, %v34_v22 }
  0x4a   :  { %v169_v17 = vpack.c.bf16 %v94_v6, %v93_v5  ;;  %v174_v18 = vpack.c.bf16 %v96_v9, %v95_v8  ;;  %v99_v20 = vmul.f32 %v88_v60, %v35_v25  ;;  %v100_v21 = vmul.f32 %v88_v60, %v36_v28 }
  0x4b   :  { %160 = vst [vmem:[#allocation5] sm:$0xff] %v159_v11   ;;  %v179_v0 = vpack.c.bf16 %v98_v15, %v97_v14  ;;  %v101_v23 = vmul.f32 %v88_v60, %v37_v31  ;;  %v102_v1 = vmul.f32 %v88_v60, %v38_v34  ;;  %v103_v24 = vmul.f32 %v88_v60, %v39_v37 }
  0x4c   :  { %196 = vst [vmem:[#allocation5 + $0x8] sm:$0xff] %v164_v12   ;;  %v184_v2 = vpack.c.bf16 %v100_v21, %v99_v20  ;;  %v104_v3 = vmul.f32 %v88_v60, %v40_v40 }
  0x4d   :  { %197 = vst [vmem:[#allocation5 + $0x10] sm:$0xff] %v169_v17   ;;  %v189_v7 = vpack.c.bf16 %v102_v1, %v101_v23 }
  0x4e   :  { %198 = vst [vmem:[#allocation5 + $0x18] sm:$0xff] %v174_v18   ;;  %v194_v10 = vpack.c.bf16 %v104_v3, %v103_v24 }
  0x4f   :  { %199 = vst [vmem:[#allocation5 + $0x20] sm:$0xff] %v179_v0  }
  0x50   :  { %200 = vst [vmem:[#allocation5 + $0x28] sm:$0xff] %v184_v2  }
  0x51   :  { %201 = vst [vmem:[#allocation5 + $0x30] sm:$0xff] %v189_v7  }
  0x52   :  { %202 = vst [vmem:[#allocation5 + $0x38] sm:$0xff] %v194_v10  }
  0x53   :  { %149 = dma.vmem_to_hbm [thread:$0]  %s142_s13, 1024, %s144_s16, [#allocation4], %s267_s17, %s267_s17, %s268_s18  }
  0x54   :  { %261 = dma.done.wait [#allocation4], 1024  }
  0x55   :  { %262 = vsyncadd [#allocation4], 4294966272 }
  0x56   :  { %154 = vsyncpa [#allocation3], 1 }
  0x57   :  { %155 = vsyncpa [#allocation4], 1 }

</bundles_post_ra>
